<compile_context>
chip_gen: v5e
topology: v5e:2x2
jax: 0.10.0
libtpu: 0.0.40
codegen_flags: <defaults>
</compile_context>

<pallas_src>
import functools
import math

import jax
import jax.numpy as jnp
from jax.experimental import pallas as pl
from jax.experimental.pallas import tpu as pltpu


# ------------------------- tiling / compile config -------------------------

# Conservative scoped-VMEM budget: fits v7x's 64 MiB physical VMEM per TC and
# still leaves double-buffering headroom on v5e/v6e.
_VMEM_LIMIT = 48 * 1024 * 1024

# Row (token) tile cap. tm=512 keeps the largest resident working set
# (x tile + 2x double-buffered weight tile + out tile, bf16) well under
# ~20 MiB even for the (3072 -> 768) FFN projection -> safe on v7x.
_TM_CAP = 512


def _pick_tm(m, cap=_TM_CAP):
    """Largest row tile <= cap that divides m and is a multiple of 8."""
    if m <= cap:
        return m
    for t in range(cap, 7, -8):
        if m % t == 0:
            return t
    return m


# ----------------------------- Pallas kernels -----------------------------

def _linear_kernel(x_ref, w_ref, b_ref, o_ref, *, act):
    """o = act(x @ w + b); bf16 matmul on the MXU, f32 accumulate + epilogue."""
    y = jnp.dot(x_ref[...], w_ref[...], preferred_element_type=jnp.float32)
    y = y + b_ref[...]
    if act == "gelu":
        # tanh-approx GELU  # TODO(synk): HF roberta uses exact erf-GELU
        c = math.sqrt(2.0 / math.pi)
        y = 0.5 * y * (1.0 + jnp.tanh(c * (y + 0.044715 * y * y * y)))
    elif act == "tanh":
        y = jnp.tanh(y)
    o_ref[...] = y.astype(o_ref.dtype)


def linear(x, w, b, act="none", out_dtype=None):
    """x: (M, K) bf16, w: (K, N) bf16, b: (N,) f32 -> (M, N)."""
    M, K = x.shape
    _, N = w.shape
    out_dtype = out_dtype or x.dtype
    tn = 768 if (N % 768 == 0) else N
    tm = _pick_tm(M)
    return pl.pallas_call(
        functools.partial(_linear_kernel, act=act),
        out_shape=jax.ShapeDtypeStruct((M, N), out_dtype),
        grid=(M // tm, N // tn),
        in_specs=[
            pl.BlockSpec((tm, K), lambda i, j: (i, 0)),
            pl.BlockSpec((K, tn), lambda i, j: (0, j)),
            pl.BlockSpec((1, tn), lambda i, j: (0, j)),
        ],
        out_specs=pl.BlockSpec((tm, tn), lambda i, j: (i, j)),
        compiler_params=pltpu.CompilerParams(
            dimension_semantics=("parallel", "parallel"),
            vmem_limit_bytes=_VMEM_LIMIT,
        ),
    )(x, w, b.reshape(1, N).astype(jnp.float32))


def _linear_res_ln_kernel(x_ref, w_ref, b_ref, r_ref, g_ref, bb_ref, o_ref,
                          *, eps):
    """o = LayerNorm(x @ w + b + residual); stats in f32, bf16 out."""
    y = jnp.dot(x_ref[...], w_ref[...], preferred_element_type=jnp.float32)
    y = y + b_ref[...] + r_ref[...].astype(jnp.float32)
    mu = jnp.mean(y, axis=-1, keepdims=True)
    yc = y - mu
    var = jnp.mean(yc * yc, axis=-1, keepdims=True)
    inv = jax.lax.rsqrt(var + eps)
    o_ref[...] = (yc * inv * g_ref[...] + bb_ref[...]).astype(o_ref.dtype)


def linear_res_ln(x, w, b, residual, gamma, beta, eps=1e-5, out_dtype=None):
    """Fused projection + residual add + LayerNorm (post-LN)."""
    M, K = x.shape
    _, N = w.shape
    out_dtype = out_dtype or residual.dtype
    tm = _pick_tm(M)
    return pl.pallas_call(
        functools.partial(_linear_res_ln_kernel, eps=eps),
        out_shape=jax.ShapeDtypeStruct((M, N), out_dtype),
        grid=(M // tm,),
        in_specs=[
            pl.BlockSpec((tm, K), lambda i: (i, 0)),
            pl.BlockSpec((K, N), lambda i: (0, 0)),
            pl.BlockSpec((1, N), lambda i: (0, 0)),
            pl.BlockSpec((tm, N), lambda i: (i, 0)),
            pl.BlockSpec((1, N), lambda i: (0, 0)),
            pl.BlockSpec((1, N), lambda i: (0, 0)),
        ],
        out_specs=pl.BlockSpec((tm, N), lambda i: (i, 0)),
        compiler_params=pltpu.CompilerParams(
            dimension_semantics=("parallel",),
            vmem_limit_bytes=_VMEM_LIMIT,
        ),
    )(x, w, b.reshape(1, N).astype(jnp.float32), residual,
      gamma.reshape(1, N).astype(jnp.float32),
      beta.reshape(1, N).astype(jnp.float32))


def _ln_kernel(x_ref, g_ref, b_ref, o_ref, *, eps):
    """Row-wise LayerNorm (no residual); stats in f32."""
    x = x_ref[...].astype(jnp.float32)
    mu = jnp.mean(x, axis=-1, keepdims=True)
    xc = x - mu
    var = jnp.mean(xc * xc, axis=-1, keepdims=True)
    inv = jax.lax.rsqrt(var + eps)
    o_ref[...] = (xc * inv * g_ref[...] + b_ref[...]).astype(o_ref.dtype)


def layer_norm(x, gamma, beta, eps=1e-5, out_dtype=None):
    M, H = x.shape
    out_dtype = out_dtype or x.dtype
    tm = _pick_tm(M)
    return pl.pallas_call(
        functools.partial(_ln_kernel, eps=eps),
        out_shape=jax.ShapeDtypeStruct((M, H), out_dtype),
        grid=(M // tm,),
        in_specs=[
            pl.BlockSpec((tm, H), lambda i: (i, 0)),
            pl.BlockSpec((1, H), lambda i: (0, 0)),
            pl.BlockSpec((1, H), lambda i: (0, 0)),
        ],
        out_specs=pl.BlockSpec((tm, H), lambda i: (i, 0)),
        compiler_params=pltpu.CompilerParams(
            dimension_semantics=("parallel",),
            vmem_limit_bytes=_VMEM_LIMIT,
        ),
    )(x, gamma.reshape(1, H).astype(jnp.float32),
      beta.reshape(1, H).astype(jnp.float32))


def _attn_kernel(qkv_ref, bias_ref, o_ref, *, nH, dH, H, scale):
    """Multi-head softmax attention for one batch row, all heads per step.

    qkv_ref : (1, S, 3H) bf16 -- packed [Q | K | V] along the lane axis.
    bias_ref: (1, 1, S)  f32  -- precomputed additive mask bias.
    o_ref   : (1, S, H)  bf16 -- lane-dense concatenated head outputs.
    """
    qkv = qkv_ref[0]          # (S, 3H) bf16, loaded once
    bias = bias_ref[0]        # (1, S), broadcasts over query rows
    outs = []
    for h in range(nH):       # static unroll over heads
        q = qkv[:, h * dH:(h + 1) * dH]
        k = qkv[:, H + h * dH:H + (h + 1) * dH]
        v = qkv[:, 2 * H + h * dH:2 * H + (h + 1) * dH]
        # contract dH dims directly: no explicit k.T -> no XLU transpose pass
        s = jax.lax.dot_general(
            q, k, (((1,), (1,)), ((), ())),
            preferred_element_type=jnp.float32) * scale          # (S, S) f32
        s = s + bias
        s = s - jnp.max(s, axis=-1, keepdims=True)
        p = jnp.exp(s)
        denom = jnp.sum(p, axis=-1, keepdims=True)
        p = p * pl.reciprocal(denom, approx=True)                # EUP slot
        ctx = jnp.dot(p.astype(jnp.bfloat16), v,
                      preferred_element_type=jnp.float32)        # (S, dH)
        outs.append(ctx)
    o_ref[0] = jnp.concatenate(outs, axis=-1).astype(o_ref.dtype)


def attention(qkv, bias, nH, dH, H):
    """qkv: (B, S, 3H) bf16; bias: (B, 1, S) f32 -> (B, S, H) bf16."""
    B, S, threeH = qkv.shape
    return pl.pallas_call(
        functools.partial(_attn_kernel, nH=nH, dH=dH, H=H,
                          scale=1.0 / math.sqrt(dH)),
        out_shape=jax.ShapeDtypeStruct((B, S, H), qkv.dtype),
        grid=(B,),
        in_specs=[
            pl.BlockSpec((1, S, threeH), lambda b: (b, 0, 0)),
            pl.BlockSpec((1, 1, S), lambda b: (b, 0, 0)),
        ],
        out_specs=pl.BlockSpec((1, S, H), lambda b: (b, 0, 0)),
        compiler_params=pltpu.CompilerParams(
            dimension_semantics=("parallel",),
            vmem_limit_bytes=_VMEM_LIMIT,
        ),
    )(qkv, bias)


def _pool_fc_kernel(cls_ref, wp_ref, bp_ref, wc_ref, bc_ref, o_ref):
    """logits = tanh(cls @ Wp + bp) @ Wc_pad + bc_pad (Wc padded to 128 lanes)."""
    pooled = jnp.dot(cls_ref[...], wp_ref[...],
                     preferred_element_type=jnp.float32)
    pooled = jnp.tanh(pooled + bp_ref[...])
    logits = jnp.dot(pooled.astype(jnp.bfloat16), wc_ref[...],
                     preferred_element_type=jnp.float32)
    o_ref[...] = logits + bc_ref[...]


def pool_and_classify(cls, wp, bp, wc_pad, bc_pad):
    B, H = cls.shape
    NP = wc_pad.shape[1]
    return pl.pallas_call(
        _pool_fc_kernel,
        out_shape=jax.ShapeDtypeStruct((B, NP), jnp.float32),
        grid=(1,),
        in_specs=[
            pl.BlockSpec((B, H), lambda i: (0, 0)),
            pl.BlockSpec((H, H), lambda i: (0, 0)),
            pl.BlockSpec((1, H), lambda i: (0, 0)),
            pl.BlockSpec((H, NP), lambda i: (0, 0)),
            pl.BlockSpec((1, NP), lambda i: (0, 0)),
        ],
        out_specs=pl.BlockSpec((B, NP), lambda i: (0, 0)),
    )(cls, wp, bp.reshape(1, H).astype(jnp.float32),
      wc_pad, bc_pad.reshape(1, NP).astype(jnp.float32))


# ----------------------------- model wrapper -----------------------------

def init_params(key, cfg):
    H, I = cfg["hidden"], cfg["intermediate"]
    V, P, T = cfg["vocab"], cfg["max_pos"], cfg["type_vocab"]
    C, L = cfg["classes"], cfg["layers"]
    ks = iter(jax.random.split(key, 16 * L + 16))

    def nrm(shape, dtype=jnp.bfloat16):
        return (0.02 * jax.random.normal(next(ks), shape, jnp.float32)).astype(dtype)

    def zeros(n):
        return jnp.zeros((n,), jnp.float32)

    def ones(n):
        return jnp.ones((n,), jnp.float32)

    # classification head padded to 128 output lanes (unmasked lane-dense stores)
    NP = 128
    fc_w = nrm((H, C), jnp.float32)
    fc_b = zeros(C)
    fc_w_pad = jnp.zeros((H, NP), jnp.float32).at[:, :C].set(fc_w)
    fc_w_pad = fc_w_pad.astype(jnp.bfloat16)
    fc_b_pad = jnp.zeros((NP,), jnp.float32).at[:C].set(fc_b)

    params = {
        "emb": {
            "word": nrm((V, H), jnp.float32),
            "pos": nrm((P, H), jnp.float32),
            "type": nrm((T, H), jnp.float32),
            "ln_g": ones(H), "ln_b": zeros(H),
        },
        "layers": [],
        "pool_W": nrm((H, H)), "pool_b": zeros(H),
        "fc_W_pad": fc_w_pad, "fc_b_pad": fc_b_pad,   # nn.Linear(768, 10), padded
    }
    for _ in range(L):
        params["layers"].append({
            # fused Q|K|V projection: one (H, 3H) weight, h read once per layer
            "Wqkv": nrm((H, 3 * H)), "bqkv": zeros(3 * H),
            "Wo": nrm((H, H)), "bo": zeros(H),
            "ln1_g": ones(H), "ln1_b": zeros(H),
            "W1": nrm((H, I)), "b1": zeros(I),
            "W2": nrm((I, H)), "b2": zeros(H),
            "ln2_g": ones(H), "ln2_b": zeros(H),
        })
    return params


def bert_class_forward(params, ids, mask, token_type_ids, cfg):
    """Mirrors BERTClass.forward: pooled RoBERTa features -> fc(768, 10)."""
    B, S = ids.shape
    H, nH, C = cfg["hidden"], cfg["heads"], cfg["classes"]
    dH = H // nH
    emb = params["emb"]

    # --- embeddings (gather is glue; LayerNorm in Pallas, no zeros residual) ---
    # TODO(synk): RoBERTa offsets position ids by padding_idx+1; plain arange here.
    pos = jnp.arange(S, dtype=jnp.int32)
    x = (jnp.take(emb["word"], ids, axis=0)
         + jnp.take(emb["pos"], pos, axis=0)[None, :, :]
         + jnp.take(emb["type"], token_type_ids, axis=0))
    x = x.reshape(B * S, H).astype(jnp.float32)
    h = layer_norm(x, emb["ln_g"], emb["ln_b"], out_dtype=jnp.bfloat16)

    # additive attention bias, precomputed once per forward
    bias = ((1.0 - mask.astype(jnp.float32)) * -10000.0).reshape(B, 1, S)

    # --- transformer encoder layers ---
    for lyr in params["layers"]:
        qkv = linear(h, lyr["Wqkv"], lyr["bqkv"])                   # (B*S, 3H) bf16
        ctx = attention(qkv.reshape(B, S, 3 * H), bias, nH, dH, H)  # (B, S, H)
        ctx = ctx.reshape(B * S, H)
        # attention out-proj fused with residual add + LayerNorm (post-LN)
        h = linear_res_ln(ctx, lyr["Wo"], lyr["bo"], h,
                          lyr["ln1_g"], lyr["ln1_b"])
        ff = linear(h, lyr["W1"], lyr["b1"], act="gelu")            # (B*S, I) bf16
        # FFN down-proj fused with residual add + LayerNorm
        h = linear_res_ln(ff, lyr["W2"], lyr["b2"], h,
                          lyr["ln2_g"], lyr["ln2_b"])

    # --- pooler tanh(W h[:,0] + b) fused with fc(768 -> 10) head ---
    cls = h.reshape(B, S, H)[:, 0, :]                               # (B, H) bf16
    logits = pool_and_classify(cls, params["pool_W"], params["pool_b"],
                               params["fc_W_pad"], params["fc_b_pad"])
    return logits[:, :C]                                            # (B, 10) f32


# --------------------------------- main ----------------------------------

if __name__ == "__main__":
    cfg = dict(
        hidden=768,        # fc = Linear(768, 10) fixes the hidden size
        heads=12,
        intermediate=3072,
        vocab=64,          # small synthetic vocab
        max_pos=16,
        type_vocab=2,
        classes=10,
        layers=2,          # small stand-in for roberta-base's 12 layers
    )
    B, S = 2, 8

    key = jax.random.PRNGKey(0)
    k_param, k_ids = jax.random.split(key)
    params = init_params(k_param, cfg)

    ids = jax.random.randint(k_ids, (B, S), 0, cfg["vocab"], dtype=jnp.int32)
    mask = jnp.ones((B, S), jnp.int32).at[1, 6:].set(0)   # pad last 2 tokens of row 1
    token_type_ids = jnp.zeros((B, S), jnp.int32)

    logits = bert_class_forward(params, ids, mask, token_type_ids, cfg)
    logits = jax.block_until_ready(logits)
    assert logits.shape == (B, cfg["classes"])
    assert logits.dtype == jnp.float32
    assert bool(jnp.all(jnp.isfinite(logits)))
    print("KERNEL_OK")
</pallas_src>

<mosaic_0001>
module attributes {stable_mosaic.version = 11 : i64} {
  func.func @_ln_kernel(%arg0: i32, %arg1: memref<16x768xf32, #tpu.memory_space<vmem>>, %arg2: memref<1x768xf32, #tpu.memory_space<vmem>>, %arg3: memref<1x768xf32, #tpu.memory_space<vmem>>, %arg4: memref<16x768xbf16, #tpu.memory_space<vmem>>) attributes {dimension_semantics = [#tpu.dimension_semantics<parallel>], iteration_bounds = array<i64: 1>, scalar_prefetch = 0 : i64, scratch_operands = 0 : i64, tpu.core_type = #tpu.core_type<tc>, window_params = [{transform_indices = @transform_0, window_bounds = array<i64: 16, 768>}, {pipeline_mode = #tpu.pipeline_mode<synchronous>, transform_indices = @transform_1, window_bounds = array<i64: 1, 768>}, {pipeline_mode = #tpu.pipeline_mode<synchronous>, transform_indices = @transform_2, window_bounds = array<i64: 1, 768>}, {transform_indices = @transform_3, window_bounds = array<i64: 16, 768>}]} {
    %c0 = arith.constant 0 : index
    %c0_0 = arith.constant 0 : index
    %0 = vector.load %arg1[%c0, %c0_0] : memref<16x768xf32, #tpu.memory_space<vmem>>, vector<16x768xf32>
    %cst = arith.constant dense<0.000000e+00> : vector<16xf32>
    %1 = vector.multi_reduction <add>, %0, %cst [1] : vector<16x768xf32> to vector<16xf32>
    %2 = vector.shape_cast %1 : vector<16xf32> to vector<16x1xf32>
    %cst_1 = arith.constant 7.680000e+02 : f32
    %3 = vector.broadcast %cst_1 : f32 to vector<16x1xf32>
    %4 = arith.divf %2, %3 : vector<16x1xf32>
    %5 = vector.broadcast %4 : vector<16x1xf32> to vector<16x768xf32>
    %6 = arith.subf %0, %5 : vector<16x768xf32>
    %7 = arith.mulf %6, %6 : vector<16x768xf32>
    %cst_2 = arith.constant dense<0.000000e+00> : vector<16xf32>
    %8 = vector.multi_reduction <add>, %7, %cst_2 [1] : vector<16x768xf32> to vector<16xf32>
    %9 = vector.shape_cast %8 : vector<16xf32> to vector<16x1xf32>
    %cst_3 = arith.constant 7.680000e+02 : f32
    %10 = vector.broadcast %cst_3 : f32 to vector<16x1xf32>
    %11 = arith.divf %9, %10 : vector<16x1xf32>
    %cst_4 = arith.constant 9.99999974E-6 : f32
    %12 = vector.broadcast %cst_4 : f32 to vector<16x1xf32>
    %13 = arith.addf %11, %12 : vector<16x1xf32>
    %14 = math.rsqrt %13 : vector<16x1xf32>
    %15 = vector.broadcast %14 : vector<16x1xf32> to vector<16x768xf32>
    %16 = arith.mulf %6, %15 : vector<16x768xf32>
    %c0_5 = arith.constant 0 : index
    %c0_6 = arith.constant 0 : index
    %17 = vector.load %arg2[%c0_5, %c0_6] : memref<1x768xf32, #tpu.memory_space<vmem>>, vector<1x768xf32>
    %18 = vector.broadcast %17 : vector<1x768xf32> to vector<16x768xf32>
    %19 = arith.mulf %16, %18 : vector<16x768xf32>
    %c0_7 = arith.constant 0 : index
    %c0_8 = arith.constant 0 : index
    %20 = vector.load %arg3[%c0_7, %c0_8] : memref<1x768xf32, #tpu.memory_space<vmem>>, vector<1x768xf32>
    %21 = vector.broadcast %20 : vector<1x768xf32> to vector<16x768xf32>
    %22 = arith.addf %19, %21 : vector<16x768xf32>
    %23 = arith.truncf %22 : vector<16x768xf32> to vector<16x768xbf16>
    %c0_9 = arith.constant 0 : index
    %c0_10 = arith.constant 0 : index
    %24 = vector.load %arg4[%c0_9, %c0_10] : memref<16x768xbf16, #tpu.memory_space<vmem>>, vector<16x768xbf16>
    tpu.vector_store %arg4[%c0_9, %c0_10], %23 {strides = array<i32>} : memref<16x768xbf16, #tpu.memory_space<vmem>>, vector<16x768xbf16>,
    return
  }
  func.func @transform_0(%arg0: i32) -> (i32, i32) {
    %c0_i32 = arith.constant 0 : i32
    %c0_i32_0 = arith.constant 0 : i32
    return %arg0, %c0_i32 : i32, i32
  }
  func.func @transform_1(%arg0: i32) -> (i32, i32) {
    %c0_i32 = arith.constant 0 : i32
    %c0_i32_0 = arith.constant 0 : i32
    %c0_i32_1 = arith.constant 0 : i32
    return %c0_i32, %c0_i32_0 : i32, i32
  }
  func.func @transform_2(%arg0: i32) -> (i32, i32) {
    %c0_i32 = arith.constant 0 : i32
    %c0_i32_0 = arith.constant 0 : i32
    %c0_i32_1 = arith.constant 0 : i32
    return %c0_i32, %c0_i32_0 : i32, i32
  }
  func.func @transform_3(%arg0: i32) -> (i32, i32) {
    %c0_i32 = arith.constant 0 : i32
    %c0_i32_0 = arith.constant 0 : i32
    return %arg0, %c0_i32 : i32, i32
  }
}

</mosaic_0001>

<bundles_post_ra>
// kernel: tpu_custom_call.1
= control target key start
LH: loop header
LB: loop body
LE: loop exit
PB: predicated region body
PF: predicated region fallthrough
CT: control target
= control target key end

     0   :  { %8 = vsyncpa [#allocation3], 0  ;;  %s485_s0 = inlined_call_operand.hbm [shape: f32[16,768], index: 0, kind: input, shape index: {}]   ;;  %s486_s1 = inlined_call_operand.hbm [shape: f32[1,768], index: 1, kind: input, shape index: {}]   ;;  %s487_s2 = inlined_call_operand.hbm [shape: f32[1,768], index: 2, kind: input, shape index: {}]   ;;  %s488_s3 = inlined_call_operand.hbm [shape: bf16[16,768], index: 3, kind: output, shape index: {}]  }
   0x1   :  { %9 = vsyncpa [#allocation6], 0  ;;  %s29_s14 = sshll.u32 %s486_s1, 4  ;;  %s30_s14 = int_to_ptr.hbm [resolvable:$true] %s29_s14 }
   0x2   :  { %10 = vsyncpa [#allocation4], 0  ;;  %s368_s15 = smov [#allocation5]   ;;  %s15_s19 = sshll.u32 %s485_s0, 4  ;;  %s16_s19 = int_to_ptr.hbm [resolvable:$true] %s15_s19 }
   0x3   :  { %s31_s16 = sshll.u32 %s368_s15, 4  ;;  %s369_s20 = smov [#allocation2]   ;;  %s32_s16 = int_to_ptr.vmem [resolvable:$true] %s31_s16 }
   0x4   :  { %34 = dma.hbm_to_vmem [thread:$0]  %s30_s14, 96, %s32_s16, [#allocation6]  }
   0x5   :  { %s17_s21 = sshll.u32 %s369_s20, 4  ;;  %s370_s22 = smov 768   ;;  %s18_s21 = int_to_ptr.vmem [resolvable:$true] %s17_s21 }
   0x6   :  { %s371_s23 = smov 48   ;;  %s40_s1 = sshll.u32 %s487_s2, 4  ;;  %s41_s1 = int_to_ptr.hbm [resolvable:$true] %s40_s1 }
   0x7   :  { %23 = dma.hbm_to_vmem [thread:$0]  %s16_s19, 1536, %s18_s21, [#allocation3], %s370_s22, %s370_s22, %s371_s23  }
   0x8   :  { %s372_s26 = smov [#allocation7]  }
   0x9   :  { %s42_s27 = sshll.u32 %s372_s26, 4  ;;  %s43_s27 = int_to_ptr.vmem [resolvable:$true] %s42_s27 }
   0xa   :  { %45 = dma.hbm_to_vmem [thread:$0]  %s41_s1, 96, %s43_s27, [#allocation6]  }
   0xb   :  { %362 = dma.done.wait [#allocation3], 1536  }
   0xc   :  { %363 = vsyncadd [#allocation3], 4294965760 }
   0xd   :  { %364 = dma.done.wait [#allocation6], 192  }
   0xe   :  { %365 = vsyncadd [#allocation6], 4294967104  ;;  %v58_v0 = vld [vmem:[#allocation2] sm:$0xff]  ;;  %v59_v1 = vld [vmem:[#allocation2 + $0x8] sm:$0xff]  ;;  %v373_v22 = vmov 768.0   ;;  %s374_s0 = smov [#allocation8]  }
   0xf   :  { %v60_v2 = vld [vmem:[#allocation2 + $0x10] sm:$0xff]  ;;  %v61_v3 = vld [vmem:[#allocation2 + $0x18] sm:$0xff]  ;;  %v70_v4 = vadd.f32 %v59_v1, %v58_v0  ;;  %v66_v7 = vld [vmem:[#allocation2 + $0x40] sm:$0xff]  ;;  %260 = vrcp.f32 %v373_v22  ;;  %s235_s2 = sshll.u32 %s374_s0, 4  ;;  %s237_s30 = sshll.u32 %s488_s3, 4  ;;  %s236_s2 = int_to_ptr.vmem [resolvable:$true] %s235_s2  ;;  %s238_s30 = int_to_ptr.hbm [resolvable:$true] %s237_s30 }
  0x10   :  { %v64_v5 = vld [vmem:[#allocation2 + $0x30] sm:$0xff]  ;;  %v65_v6 = vld [vmem:[#allocation2 + $0x38] sm:$0xff]  ;;  %v62_v10 = vld [vmem:[#allocation2 + $0x20] sm:$0xff]  ;;  %s375_s4 = smov 384   ;;  %s376_s5 = smov 24  }
  0x11   :  { %v71_v8 = vadd.f32 %v70_v4, %v60_v2  ;;  %v77_v9 = vadd.f32 %v65_v6, %v64_v5  ;;  %v67_v11 = vld [vmem:[#allocation2 + $0x48] sm:$0xff]  ;;  %v68_v17 = vld [vmem:[#allocation2 + $0x50] sm:$0xff]  ;;  %v69_v20 = vld [vmem:[#allocation2 + $0x58] sm:$0xff] }
  0x12   :  { %v63_v14 = vld [vmem:[#allocation2 + $0x28] sm:$0xff] }
  0x13   :  { %v72_v12 = vadd.f32 %v71_v8, %v61_v3  ;;  %v78_v13 = vadd.f32 %v77_v9, %v66_v7 }
  0x15   :  { %v73_v15 = vadd.f32 %v72_v12, %v62_v10  ;;  %v79_v16 = vadd.f32 %v78_v13, %v67_v11  ;;  %v261_v23 = vpop.eup %260  ;;  %v454_v12 = vld [vmem:[#allocation5] sm:$0x3f] }
  0x16   :  { %v85_v24 = vmul.f32 768.0, %v261_v23  ;;  %vm89_vm0 = vweird.f32 %v261_v23 }
  0x17   :  { %v74_v18 = vadd.f32 %v73_v15, %v63_v14  ;;  %v80_v19 = vadd.f32 %v79_v16, %v68_v17 }
  0x18   :  { %v86_v25 = vsub.f32 1.0, %v85_v24  ;;  %v174_v24 = vperm.slane %v454_v12, 5 }
  0x19   :  { %75 = vadd.xlane.f32.xlu0 %v74_v18  ;;  %v81_v21 = vadd.f32 %v80_v19, %v69_v20  ;;  %v170_v18 = vperm.slane %v454_v12, 1  ;;  %v171_v19 = vperm.slane %v454_v12, 2 }
  0x1a   :  { %v87_v26 = vmul.f32 %v261_v23, %v86_v25 }
  0x1c   :  { %v88_v27 = vadd.f32 %v261_v23, %v87_v26 }
  0x1e   :  { %v90_v28 = vsel %vm89_vm0, %v261_v23, %v88_v27 }
  0x21   :  { %82 = vadd.xlane.f32.xlu0 %v81_v21  ;;  %v173_v21 = vperm.slane %v454_v12, 4 }
  0x8c   :  { %v76_v29 = vpop.xlane.xlu0 %75 }
  0x8d   :  { %v91_v30 = vmul.f32 %v90_v28, %v76_v29 }
  0x8f   :  { %v406_v31 = vsub.f32 %v58_v0, %v91_v30  ;;  %v408_v32 = vsub.f32 %v59_v1, %v91_v30  ;;  %v410_v33 = vsub.f32 %v60_v2, %v91_v30  ;;  %v412_v34 = vsub.f32 %v61_v3, %v91_v30 }
  0x90   :  { %v418_v37 = vsub.f32 %v62_v10, %v91_v30  ;;  %v422_v41 = vsub.f32 %v63_v14, %v91_v30  ;;  %v456_v14 = vld [vmem:[#allocation7] sm:$0x3f] }
  0x91   :  { %v105_v35 = vmul.f32 %v406_v31, %v406_v31  ;;  %v106_v36 = vmul.f32 %v408_v32, %v408_v32  ;;  %v107_v38 = vmul.f32 %v410_v33, %v410_v33  ;;  %v108_v43 = vmul.f32 %v412_v34, %v412_v34 }
  0x92   :  { %v109_v45 = vmul.f32 %v418_v37, %v418_v37  ;;  %v110_v50 = vmul.f32 %v422_v41, %v422_v41  ;;  %v195_v25 = vperm.slane %v456_v14, 0  ;;  %v196_v26 = vperm.slane %v456_v14, 1 }
  0x93   :  { %v117_v39 = vadd.f32 %v106_v36, %v105_v35  ;;  %v197_v27 = vperm.slane %v456_v14, 2  ;;  %v199_v29 = vperm.slane %v456_v14, 4 }
  0x94   :  { %v83_v40 = vpop.xlane.xlu0 %82 }
  0x95   :  { %v92_v42 = vmul.f32 %v90_v28, %v83_v40  ;;  %v118_v44 = vadd.f32 %v117_v39, %v107_v38 }
  0x97   :  { %v119_v46 = vadd.f32 %v118_v44, %v108_v43  ;;  %v428_v47 = vsub.f32 %v64_v5, %v92_v42  ;;  %v430_v48 = vsub.f32 %v65_v6, %v92_v42  ;;  %v432_v49 = vsub.f32 %v66_v7, %v92_v42 }
  0x98   :  { %v436_v52 = vsub.f32 %v67_v11, %v92_v42  ;;  %v442_v56 = vsub.f32 %v68_v17, %v92_v42  ;;  %v446_v59 = vsub.f32 %v69_v20, %v92_v42  ;;  %v169_v17 = vperm.slane %v454_v12, 0 }
  0x99   :  { %v120_v51 = vadd.f32 %v119_v46, %v109_v45  ;;  %v111_v53 = vmul.f32 %v428_v47, %v428_v47  ;;  %v112_v54 = vmul.f32 %v430_v48, %v430_v48  ;;  %v113_v57 = vmul.f32 %v432_v49, %v432_v49 }
  0x9a   :  { %v114_v60 = vmul.f32 %v436_v52, %v436_v52  ;;  %v115_v62 = vmul.f32 %v442_v56, %v442_v56  ;;  %v116_v0 = vmul.f32 %v446_v59, %v446_v59  ;;  %v172_v20 = vperm.slane %v454_v12, 3 }
  0x9b   :  { %v121_v55 = vadd.f32 %v120_v51, %v110_v50  ;;  %v124_v58 = vadd.f32 %v112_v54, %v111_v53  ;;  %v200_v42 = vperm.slane %v456_v14, 5 }
  0x9d   :  { %122 = vadd.xlane.f32.xlu1 %v121_v55  ;;  %v125_v61 = vadd.f32 %v124_v58, %v113_v57 }
  0x9f   :  { %v126_v63 = vadd.f32 %v125_v61, %v114_v60 }
  0xa1   :  { %v127_v1 = vadd.f32 %v126_v63, %v115_v62 }
  0xa3   :  { %v128_v2 = vadd.f32 %v127_v1, %v116_v0 }
  0xa5   :  { %129 = vadd.xlane.f32.xlu1 %v128_v2 }
 0x110   :  { %v123_v3 = vpop.xlane.xlu1 %122 }
 0x111   :  { %v131_v4 = vmul.f32 %v123_v3, %v90_v28 }
 0x113   :  { %v133_v5 = vadd.f32 1e-05, %v131_v4 }
 0x115   :  { %262 = vrsqrt.f32 %v133_v5  ;;  %vm141_vm2 = vweird.f32 %v133_v5 }
 0x118   :  { %v130_v6 = vpop.xlane.xlu1 %129 }
 0x119   :  { %v132_v7 = vmul.f32 %v130_v6, %v90_v28  ;;  %v198_v28 = vperm.slane %v456_v14, 3 }
 0x11b   :  { %v263_v8 = vpop.eup %262  ;;  %v134_v9 = vadd.f32 1e-05, %v132_v7 }
 0x11c   :  { %v136_v10 = vmul.f32 %v263_v8, %v133_v5  ;;  %vm142_vm1 = vweird.f32 %v263_v8 }
 0x11d   :  { %264 = vrsqrt.f32 %v134_v9  ;;  %vm143_vm3 = vmor %vm141_vm2, %vm142_vm1  ;;  %vm151_vm5 = vweird.f32 %v134_v9 }
 0x11e   :  { %v137_v11 = vmul.f32 %v263_v8, %v136_v10 }
 0x120   :  { %v138_v13 = vmul.f32 0.5, %v137_v11 }
 0x122   :  { %v139_v15 = vsub.f32 1.5, %v138_v13 }
 0x123   :  { %v265_v16 = vpop.eup %264 }
 0x124   :  { %v140_v22 = vmul.f32 %v263_v8, %v139_v15  ;;  %v146_v23 = vmul.f32 %v265_v16, %v134_v9  ;;  %vm152_vm4 = vweird.f32 %v265_v16 }
 0x125   :  { %vm153_vm6 = vmor %vm151_vm5, %vm152_vm4 }
 0x126   :  { %v144_v30 = vsel %vm143_vm3, %v263_v8, %v140_v22  ;;  %v147_v35 = vmul.f32 %v265_v16, %v146_v23 }
 0x127   :  { %v155_v36 = vmul.f32 %v144_v30, %v406_v31  ;;  %v156_v38 = vmul.f32 %v144_v30, %v408_v32  ;;  %v157_v39 = vmul.f32 %v144_v30, %v410_v33  ;;  %v158_v40 = vmul.f32 %v144_v30, %v412_v34 }
 0x128   :  { %v159_v43 = vmul.f32 %v144_v30, %v418_v37  ;;  %v160_v44 = vmul.f32 %v144_v30, %v422_v41  ;;  %v148_v45 = vmul.f32 0.5, %v147_v35 }
 0x129   :  { %v181_v46 = vmul.f32 %v169_v17, %v155_v36  ;;  %v182_v50 = vmul.f32 %v170_v18, %v156_v38  ;;  %v183_v51 = vmul.f32 %v171_v19, %v157_v39  ;;  %v184_v53 = vmul.f32 %v172_v20, %v158_v40 }
 0x12a   :  { %v185_v54 = vmul.f32 %v173_v21, %v159_v43  ;;  %v186_v55 = vmul.f32 %v174_v24, %v160_v44  ;;  %v149_v31 = vsub.f32 1.5, %v148_v45 }
 0x12b   :  { %v207_v32 = vadd.f32 %v195_v25, %v181_v46  ;;  %v208_v57 = vadd.f32 %v196_v26, %v182_v50  ;;  %v209_v33 = vadd.f32 %v197_v27, %v183_v51  ;;  %v210_v58 = vadd.f32 %v198_v28, %v184_v53 }
 0x12c   :  { %v211_v34 = vadd.f32 %v199_v29, %v185_v54  ;;  %v212_v60 = vadd.f32 %v200_v42, %v186_v55  ;;  %v150_v61 = vmul.f32 %v265_v16, %v149_v31 }
 0x12d   :  { %v219_v37 = vpack.c.bf16 %v208_v57, %v207_v32  ;;  %v220_v62 = vpack.c.bf16 %v210_v58, %v209_v33 }
 0x12e   :  { %v221_v41 = vpack.c.bf16 %v212_v60, %v211_v34  ;;  %v154_v63 = vsel %vm153_vm6, %v265_v16, %v150_v61 }
 0x12f   :  { %225 = vst [vmem:[#allocation8] sm:$0xff] %v219_v37  ;;  %v161_v0 = vmul.f32 %v154_v63, %v428_v47  ;;  %v162_v1 = vmul.f32 %v154_v63, %v430_v48  ;;  %v163_v2 = vmul.f32 %v154_v63, %v432_v49  ;;  %v164_v3 = vmul.f32 %v154_v63, %v436_v52 }
 0x130   :  { %226 = vst [vmem:[#allocation8 + $0x8] sm:$0xff] %v220_v62  ;;  %v165_v4 = vmul.f32 %v154_v63, %v442_v56  ;;  %v166_v5 = vmul.f32 %v154_v63, %v446_v59 }
 0x131   :  { %227 = vst [vmem:[#allocation8 + $0x10] sm:$0xff] %v221_v41  ;;  %v187_v6 = vmul.f32 %v169_v17, %v161_v0  ;;  %v188_v7 = vmul.f32 %v170_v18, %v162_v1  ;;  %v189_v8 = vmul.f32 %v171_v19, %v163_v2  ;;  %v190_v9 = vmul.f32 %v172_v20, %v164_v3 }
 0x132   :  { %v191_v10 = vmul.f32 %v173_v21, %v165_v4  ;;  %v192_v11 = vmul.f32 %v174_v24, %v166_v5 }
 0x133   :  { %v213_v12 = vadd.f32 %v195_v25, %v187_v6  ;;  %v214_v47 = vadd.f32 %v196_v26, %v188_v7  ;;  %v215_v13 = vadd.f32 %v197_v27, %v189_v8  ;;  %v216_v48 = vadd.f32 %v198_v28, %v190_v9 }
 0x134   :  { %v217_v49 = vadd.f32 %v199_v29, %v191_v10  ;;  %v218_v52 = vadd.f32 %v200_v42, %v192_v11 }
 0x135   :  { %v222_v56 = vpack.c.bf16 %v214_v47, %v213_v12  ;;  %v223_v59 = vpack.c.bf16 %v216_v48, %v215_v13 }
 0x136   :  { %v224_v14 = vpack.c.bf16 %v218_v52, %v217_v49 }
 0x137   :  { %228 = vst [vmem:[#allocation8 + $0x18] sm:$0xff] %v222_v56 }
 0x138   :  { %229 = vst [vmem:[#allocation8 + $0x20] sm:$0xff] %v223_v59 }
 0x139   :  { %230 = vst [vmem:[#allocation8 + $0x28] sm:$0xff] %v224_v14 }
 0x13a   :  { %243 = dma.vmem_to_hbm [thread:$0]  %s236_s2, 768, %s238_s30, [#allocation4], %s375_s4, %s375_s4, %s376_s5  }
 0x13b   :  { %366 = dma.done.wait [#allocation4], 768  }
 0x13c   :  { %367 = vsyncadd [#allocation4], 4294966528 }
 0x13d   :  { %248 = vsyncpa [#allocation3], 1 }
 0x13e   :  { %249 = vsyncpa [#allocation6], 1 }
 0x13f   :  { %250 = vsyncpa [#allocation4], 1 }

</bundles_post_ra>
